<compile_context>
chip_gen: v7x
topology: tpu7x:2x2x1
jax: 0.10.0
libtpu: 0.0.40
codegen_flags: <defaults>
</compile_context>

<pallas_src>
import functools

import jax
import jax.numpy as jnp
from jax.experimental import pallas as pl
from jax.experimental.pallas import tpu as pltpu


def _round_up(x, m):
    return ((x + m - 1) // m) * m


def _mlp_kernel(x_ref, w0_ref, b0_ref, w1_ref, b1_ref, o_ref):
    # Layer 0: bf16 MXU matmul, f32 accumulation; bias + ReLU in f32.
    h = jnp.dot(x_ref[...], w0_ref[...], preferred_element_type=jnp.float32)
    h = jnp.maximum(h + b0_ref[...], 0.0)
    # Layer 1: cast the intermediate back to bf16 so the MXU stays in bf16 mode.
    y = jnp.dot(h.astype(jnp.bfloat16), w1_ref[...],
                preferred_element_type=jnp.float32)
    y = jnp.maximum(y + b1_ref[...], 0.0)
    o_ref[...] = y.astype(o_ref.dtype)


@functools.partial(jax.jit, static_argnames=("block_b",))
def embed2embed_mlp(x, w0, b0, w1, b1, *, block_b=256):
    """x: [B, D] f32.  w0, w1: [D, D] pre-transposed ([in, out]).  b0, b1: [1, D]."""
    B, D = x.shape

    # bf16 operands -> full-rate MXU + half the HBM->VMEM traffic.
    xb = x.astype(jnp.bfloat16)
    w0b = w0.astype(jnp.bfloat16)
    w1b = w1.astype(jnp.bfloat16)
    b0f = b0.astype(jnp.float32).reshape(1, D)
    b1f = b1.astype(jnp.float32).reshape(1, D)

    # Batch tile: large (fills the MXU M dim), multiple of 16 (bf16 packs
    # 2 rows per sublane), never larger than the padded batch.  Pad B up to a
    # multiple of the tile and slice the result back so any batch size works.
    bb = _round_up(min(block_b, _round_up(B, 16)), 16)
    B_pad = _round_up(B, bb)
    if B_pad != B:
        xb = jnp.pad(xb, ((0, B_pad - B), (0, 0)))
    grid = (B_pad // bb,)

    cost = pl.CostEstimate(
        flops=4 * B_pad * D * D,                 # two [bb,D]x[D,D] matmuls / tile
        transcendentals=0,
        bytes_accessed=(B_pad * D * 2            # x   (bf16)
                        + 2 * D * D * 2          # W0, W1 (bf16)
                        + 2 * D * 4              # biases (f32)
                        + B_pad * D * 4),        # out (f32)
    )

    out = pl.pallas_call(
        _mlp_kernel,
        out_shape=jax.ShapeDtypeStruct((B_pad, D), jnp.float32),
        grid_spec=pl.GridSpec(
            grid=grid,
            in_specs=[
                pl.BlockSpec((bb, D), lambda i: (i, 0)),   # x tile
                pl.BlockSpec((D, D), lambda i: (0, 0)),    # W0 (VMEM-resident)
                pl.BlockSpec((1, D), lambda i: (0, 0)),    # b0
                pl.BlockSpec((D, D), lambda i: (0, 0)),    # W1 (VMEM-resident)
                pl.BlockSpec((1, D), lambda i: (0, 0)),    # b1
            ],
            out_specs=pl.BlockSpec((bb, D), lambda i: (i, 0)),
        ),
        compiler_params=pltpu.CompilerParams(
            # Batch axis is embarrassingly parallel -> shards across the two
            # v7x TensorCores whenever the grid has >= 2 steps.
            dimension_semantics=("parallel",),
        ),
        cost_estimate=cost,
    )(xb, w0b, b0f, w1b, b1f)

    return out[:B]


def _xavier_uniform(key, shape, dtype=jnp.float32):
    # Matches torch.nn.init.xavier_uniform_ for a 2-D weight [fan_out, fan_in].
    fan_out, fan_in = shape
    limit = (6.0 / (fan_in + fan_out)) ** 0.5
    return jax.random.uniform(key, shape, dtype, minval=-limit, maxval=limit)


def make_params(key, d_model):
    """Parameter init mirroring Embed2EmbedMLP.__init__ (n_layers=1)."""
    k0, k1 = jax.random.split(key, 2)
    # PyTorch Linear stores W as [out, in]; xavier_uniform_ on that shape,
    # biases zeroed.  Pre-transpose to [in, out] for the kernel (x @ W == x @ W_pt.T).
    w_start = _xavier_uniform(k0, (d_model, d_model))   # layer_start.weight
    w_end = _xavier_uniform(k1, (d_model, d_model))     # layer_end.weight
    b_start = jnp.zeros((1, d_model), jnp.float32)
    b_end = jnp.zeros((1, d_model), jnp.float32)
    return w_start.T, b_start, w_end.T, b_end


def reference_forward_f32(x, w0, b0, w1, b1):
    h = jnp.maximum(x @ w0 + b0, 0.0)
    return jnp.maximum(h @ w1 + b1, 0.0)


def reference_forward_bf16(x, w0, b0, w1, b1):
    """Reference matching the kernel's numerics (bf16 operands, f32 accumulate)."""
    f32 = jnp.float32
    xb = x.astype(jnp.bfloat16).astype(f32)
    w0b = w0.astype(jnp.bfloat16).astype(f32)
    w1b = w1.astype(jnp.bfloat16).astype(f32)
    h = jnp.maximum(xb @ w0b + b0, 0.0)
    hb = h.astype(jnp.bfloat16).astype(f32)
    return jnp.maximum(hb @ w1b + b1, 0.0)


if __name__ == "__main__":
    d_model = 256   # module default
    key = jax.random.PRNGKey(0)
    kx, kp = jax.random.split(key)
    w0, b0, w1, b1 = make_params(kp, d_model)

    # Case 1: batch not a multiple of the tile -> exercises padding/tail path.
    x1 = jax.random.normal(kx, (50, d_model), jnp.float32)
    out1 = jax.block_until_ready(embed2embed_mlp(x1, w0, b0, w1, b1))

    # Case 2: larger batch, smaller tile -> multi-step parallel grid.
    x2 = jax.random.normal(jax.random.fold_in(kx, 1), (512, d_model), jnp.float32)
    out2 = jax.block_until_ready(embed2embed_mlp(x2, w0, b0, w1, b1, block_b=128))

    for x, out in ((x1, out1), (x2, out2)):
        assert out.shape == x.shape and out.dtype == jnp.float32
        ref_bf16 = reference_forward_bf16(x, w0, b0, w1, b1)
        assert jnp.allclose(out, ref_bf16, atol=2e-3, rtol=2e-3), \
            "mismatch vs bf16-matched reference"
        ref_f32 = reference_forward_f32(x, w0, b0, w1, b1)
        assert jnp.allclose(out, ref_f32, atol=1e-1, rtol=1e-1), \
            "mismatch vs f32 reference (sanity)"

    print("KERNEL_OK")
</pallas_src>

<mosaic_0001>
module attributes {stable_mosaic.version = 11 : i64} {
  func.func @_mlp_kernel(%arg0: i32, %arg1: memref<64x256xbf16, #tpu.memory_space<vmem>>, %arg2: memref<256x256xbf16, #tpu.memory_space<vmem>>, %arg3: memref<1x256xf32, #tpu.memory_space<vmem>>, %arg4: memref<256x256xbf16, #tpu.memory_space<vmem>>, %arg5: memref<1x256xf32, #tpu.memory_space<vmem>>, %arg6: memref<64x256xf32, #tpu.memory_space<vmem>>) attributes {dimension_semantics = [#tpu.dimension_semantics<parallel>], iteration_bounds = array<i64: 1>, scalar_prefetch = 0 : i64, scratch_operands = 0 : i64, tpu.core_type = #tpu.core_type<tc>, window_params = [{transform_indices = @transform_0, window_bounds = array<i64: 64, 256>}, {pipeline_mode = #tpu.pipeline_mode<synchronous>, transform_indices = @transform_1, window_bounds = array<i64: 256, 256>}, {pipeline_mode = #tpu.pipeline_mode<synchronous>, transform_indices = @transform_2, window_bounds = array<i64: 1, 256>}, {pipeline_mode = #tpu.pipeline_mode<synchronous>, transform_indices = @transform_3, window_bounds = array<i64: 256, 256>}, {pipeline_mode = #tpu.pipeline_mode<synchronous>, transform_indices = @transform_4, window_bounds = array<i64: 1, 256>}, {transform_indices = @transform_5, window_bounds = array<i64: 64, 256>}]} {
    %c0 = arith.constant 0 : index
    %c0_0 = arith.constant 0 : index
    %0 = vector.load %arg1[%c0, %c0_0] : memref<64x256xbf16, #tpu.memory_space<vmem>>, vector<64x256xbf16>
    %c0_1 = arith.constant 0 : index
    %c0_2 = arith.constant 0 : index
    %1 = vector.load %arg2[%c0_1, %c0_2] : memref<256x256xbf16, #tpu.memory_space<vmem>>, vector<256x256xbf16>
    %cst = arith.constant dense<0.000000e+00> : vector<64x256xf32>
    %2 = tpu.matmul %0, %1, %cst {dimension_numbers = #tpu.dot_dimension_numbers<[1], [0], [0], [1], [0, 0, 1, 1], [], []>} : vector<64x256xbf16>, vector<256x256xbf16>, vector<64x256xf32> -> vector<64x256xf32>
    %c0_3 = arith.constant 0 : index
    %c0_4 = arith.constant 0 : index
    %3 = vector.load %arg3[%c0_3, %c0_4] : memref<1x256xf32, #tpu.memory_space<vmem>>, vector<1x256xf32>
    %4 = vector.broadcast %3 : vector<1x256xf32> to vector<64x256xf32>
    %5 = arith.addf %2, %4 : vector<64x256xf32>
    %cst_5 = arith.constant 0.000000e+00 : f32
    %6 = vector.broadcast %cst_5 : f32 to vector<64x256xf32>
    %7 = arith.maximumf %5, %6 : vector<64x256xf32>
    %8 = arith.truncf %7 : vector<64x256xf32> to vector<64x256xbf16>
    %c0_6 = arith.constant 0 : index
    %c0_7 = arith.constant 0 : index
    %9 = vector.load %arg4[%c0_6, %c0_7] : memref<256x256xbf16, #tpu.memory_space<vmem>>, vector<256x256xbf16>
    %cst_8 = arith.constant dense<0.000000e+00> : vector<64x256xf32>
    %10 = tpu.matmul %8, %9, %cst_8 {dimension_numbers = #tpu.dot_dimension_numbers<[1], [0], [0], [1], [0, 0, 1, 1], [], []>} : vector<64x256xbf16>, vector<256x256xbf16>, vector<64x256xf32> -> vector<64x256xf32>
    %c0_9 = arith.constant 0 : index
    %c0_10 = arith.constant 0 : index
    %11 = vector.load %arg5[%c0_9, %c0_10] : memref<1x256xf32, #tpu.memory_space<vmem>>, vector<1x256xf32>
    %12 = vector.broadcast %11 : vector<1x256xf32> to vector<64x256xf32>
    %13 = arith.addf %10, %12 : vector<64x256xf32>
    %cst_11 = arith.constant 0.000000e+00 : f32
    %14 = vector.broadcast %cst_11 : f32 to vector<64x256xf32>
    %15 = arith.maximumf %13, %14 : vector<64x256xf32>
    %c0_12 = arith.constant 0 : index
    %c0_13 = arith.constant 0 : index
    %16 = vector.load %arg6[%c0_12, %c0_13] : memref<64x256xf32, #tpu.memory_space<vmem>>, vector<64x256xf32>
    tpu.vector_store %arg6[%c0_12, %c0_13], %15 {strides = array<i32>} : memref<64x256xf32, #tpu.memory_space<vmem>>, vector<64x256xf32>,
    return
  }
  func.func @transform_0(%arg0: i32) -> (i32, i32) {
    %c0_i32 = arith.constant 0 : i32
    %c0_i32_0 = arith.constant 0 : i32
    return %arg0, %c0_i32 : i32, i32
  }
  func.func @transform_1(%arg0: i32) -> (i32, i32) {
    %c0_i32 = arith.constant 0 : i32
    %c0_i32_0 = arith.constant 0 : i32
    %c0_i32_1 = arith.constant 0 : i32
    return %c0_i32, %c0_i32_0 : i32, i32
  }
  func.func @transform_2(%arg0: i32) -> (i32, i32) {
    %c0_i32 = arith.constant 0 : i32
    %c0_i32_0 = arith.constant 0 : i32
    %c0_i32_1 = arith.constant 0 : i32
    return %c0_i32, %c0_i32_0 : i32, i32
  }
  func.func @transform_3(%arg0: i32) -> (i32, i32) {
    %c0_i32 = arith.constant 0 : i32
    %c0_i32_0 = arith.constant 0 : i32
    %c0_i32_1 = arith.constant 0 : i32
    return %c0_i32, %c0_i32_0 : i32, i32
  }
  func.func @transform_4(%arg0: i32) -> (i32, i32) {
    %c0_i32 = arith.constant 0 : i32
    %c0_i32_0 = arith.constant 0 : i32
    %c0_i32_1 = arith.constant 0 : i32
    return %c0_i32, %c0_i32_0 : i32, i32
  }
  func.func @transform_5(%arg0: i32) -> (i32, i32) {
    %c0_i32 = arith.constant 0 : i32
    %c0_i32_0 = arith.constant 0 : i32
    return %arg0, %c0_i32 : i32, i32
  }
}

</mosaic_0001>

<bundles_post_ra>
// kernel: embed2embed_mlp.1
= control target key start
LH: loop header
LB: loop body
LE: loop exit
PB: predicated region body
PF: predicated region fallthrough
CT: control target
= control target key end

     0   :  { %s1174_s1 = inlined_call_operand.vmem [shape: bf16[256,256], index: 1, kind: input, shape index: {}]   ;;  %s1175_s0 = inlined_call_operand.vmem [shape: bf16[64,256], index: 0, kind: input, shape index: {}]   ;;  %s1176_s3 = inlined_call_operand.vmem [shape: bf16[256,256], index: 3, kind: input, shape index: {}]   ;;  %s1177_s2 = inlined_call_operand.vmem [shape: f32[1,256], index: 2, kind: input, shape index: {}]   ;;  %s1178_s4 = inlined_call_operand.vmem [shape: f32[1,256], index: 4, kind: input, shape index: {}]   ;;  %s1179_s5 = inlined_call_operand.vmem [shape: f32[64,256], index: 5, kind: output, shape index: {}]  }
   0x1   :  { %v754_v0 = vld [vmem:[%s1174_s1 + $0x4] ss:$8 sps:$4 sm:$0xff]   ;;  %v756_v1 = vld [vmem:[%s1174_s1] ss:$8 sps:$4 sm:$0xff]   ;;  %v757_v2 = vld [vmem:[%s1174_s1 + $0x14] ss:$8 sps:$4 sm:$0xff]  }
   0x2   :  { %272 = vmatprep.subr.bf16.mxu0 %v754_v0  ;;  %v759_v3 = vld [vmem:[%s1174_s1 + $0x10] ss:$8 sps:$4 sm:$0xff]   ;;  %v760_v4 = vld [vmem:[%s1174_s1 + $0x24] ss:$8 sps:$4 sm:$0xff]   ;;  %v762_v5 = vld [vmem:[%s1174_s1 + $0x20] ss:$8 sps:$4 sm:$0xff]  }
   0x3   :  { %273 = vmatpush1.bf16.msra.mxu0 %v756_v1  ;;  %v763_v6 = vld [vmem:[%s1174_s1 + $0x34] ss:$8 sps:$4 sm:$0xff]   ;;  %v765_v7 = vld [vmem:[%s1174_s1 + $0x30] ss:$8 sps:$4 sm:$0xff]   ;;  %v766_v8 = vld [vmem:[%s1174_s1 + $0x44] ss:$8 sps:$4 sm:$0xff]  }
   0x4   :  { %274 = vmatprep.subr.bf16.mxu0 %v757_v2  ;;  %v768_v9 = vld [vmem:[%s1174_s1 + $0x40] ss:$8 sps:$4 sm:$0xff]   ;;  %v769_v10 = vld [vmem:[%s1174_s1 + $0x54] ss:$8 sps:$4 sm:$0xff]   ;;  %v771_v11 = vld [vmem:[%s1174_s1 + $0x50] ss:$8 sps:$4 sm:$0xff]  }
   0x5   :  { %v772_v12 = vld [vmem:[%s1174_s1 + $0x64] ss:$8 sps:$4 sm:$0xff]   ;;  %v774_v14 = vld [vmem:[%s1174_s1 + $0x60] ss:$8 sps:$4 sm:$0xff]   ;;  %v775_v15 = vld [vmem:[%s1174_s1 + $0x74] ss:$8 sps:$4 sm:$0xff]  }
   0x6   :  { %v804_v13 = vld [vmem:[%s1175_s0 + $0x4] ss:$8 sps:$4 sm:$0xff]   ;;  %v777_v16 = vld [vmem:[%s1174_s1 + $0x70] ss:$8 sps:$4 sm:$0xff]   ;;  %v816_v19 = vld [vmem:[%s1176_s3] ss:$8 sps:$4 sm:$0xff]  }
   0x7   :  { %275 = vmatpush1.bf16.msra.mxu0 %v759_v3  ;;  %304 = vmatprep.mubr.bf16.mxu0 %v804_v13  ;;  %v778_v17 = vld [vmem:[%s1174_s1 + $0x84] ss:$8 sps:$4 sm:$0xff]   ;;  %v817_v20 = vld [vmem:[%s1176_s3 + $0x14] ss:$8 sps:$4 sm:$0xff]   ;;  %v819_v21 = vld [vmem:[%s1176_s3 + $0x10] ss:$8 sps:$4 sm:$0xff]  }
   0x8   :  { %276 = vmatprep.subr.bf16.mxu0 %v760_v4  ;;  %v814_v18 = vld [vmem:[%s1176_s3 + $0x4] ss:$8 sps:$4 sm:$0xff]   ;;  %v780_v22 = vld [vmem:[%s1174_s1 + $0x80] ss:$8 sps:$4 sm:$0xff]   ;;  %v781_v24 = vld [vmem:[%s1174_s1 + $0x94] ss:$8 sps:$4 sm:$0xff]  }
   0x9   :  { %573 = vmatprep.subr.bf16.mxu1 %v814_v18  ;;  %v820_v23 = vld [vmem:[%s1176_s3 + $0x24] ss:$8 sps:$4 sm:$0xff]   ;;  %v822_v25 = vld [vmem:[%s1176_s3 + $0x20] ss:$8 sps:$4 sm:$0xff]   ;;  %v783_v26 = vld [vmem:[%s1174_s1 + $0x90] ss:$8 sps:$4 sm:$0xff]  }
   0xa   :  { %574 = vmatpush1.bf16.msra.mxu1 %v816_v19  ;;  %v823_v27 = vld [vmem:[%s1176_s3 + $0x34] ss:$8 sps:$4 sm:$0xff]   ;;  %v784_v28 = vld [vmem:[%s1174_s1 + $0xa4] ss:$8 sps:$4 sm:$0xff]   ;;  %v825_v29 = vld [vmem:[%s1176_s3 + $0x30] ss:$8 sps:$4 sm:$0xff]  }
   0xb   :  { %277 = vmatpush1.bf16.msra.mxu0 %v762_v5  ;;  %575 = vmatprep.subr.bf16.mxu1 %v817_v20  ;;  %v786_v30 = vld [vmem:[%s1174_s1 + $0xa0] ss:$8 sps:$4 sm:$0xff]   ;;  %v826_v31 = vld [vmem:[%s1176_s3 + $0x44] ss:$8 sps:$4 sm:$0xff]   ;;  %v787_v32 = vld [vmem:[%s1174_s1 + $0xb4] ss:$8 sps:$4 sm:$0xff]  }
   0xc   :  { %278 = vmatprep.subr.bf16.mxu0 %v763_v6  ;;  %v828_v33 = vld [vmem:[%s1176_s3 + $0x40] ss:$8 sps:$4 sm:$0xff]   ;;  %v789_v34 = vld [vmem:[%s1174_s1 + $0xb0] ss:$8 sps:$4 sm:$0xff]   ;;  %v829_v35 = vld [vmem:[%s1176_s3 + $0x54] ss:$8 sps:$4 sm:$0xff]  }
   0xd   :  { %v790_v36 = vld [vmem:[%s1174_s1 + $0xc4] ss:$8 sps:$4 sm:$0xff]   ;;  %v831_v37 = vld [vmem:[%s1176_s3 + $0x50] ss:$8 sps:$4 sm:$0xff]   ;;  %v792_v38 = vld [vmem:[%s1174_s1 + $0xc0] ss:$8 sps:$4 sm:$0xff]  }
   0xe   :  { %576 = vmatpush1.bf16.msra.mxu1 %v819_v21  ;;  %v832_v39 = vld [vmem:[%s1176_s3 + $0x64] ss:$8 sps:$4 sm:$0xff]   ;;  %v793_v40 = vld [vmem:[%s1174_s1 + $0xd4] ss:$8 sps:$4 sm:$0xff]   ;;  %v834_v41 = vld [vmem:[%s1176_s3 + $0x60] ss:$8 sps:$4 sm:$0xff]  }
   0xf   :  { %279 = vmatpush1.bf16.msra.mxu0 %v765_v7  ;;  %577 = vmatprep.subr.bf16.mxu1 %v820_v23  ;;  %v795_v42 = vld [vmem:[%s1174_s1 + $0xd0] ss:$8 sps:$4 sm:$0xff]   ;;  %v835_v43 = vld [vmem:[%s1176_s3 + $0x74] ss:$8 sps:$4 sm:$0xff]   ;;  %v796_v44 = vld [vmem:[%s1174_s1 + $0xe4] ss:$8 sps:$4 sm:$0xff]  }
  0x10   :  { %280 = vmatprep.subr.bf16.mxu0 %v766_v8  ;;  %v837_v45 = vld [vmem:[%s1176_s3 + $0x70] ss:$8 sps:$4 sm:$0xff]   ;;  %v798_v46 = vld [vmem:[%s1174_s1 + $0xe0] ss:$8 sps:$4 sm:$0xff]   ;;  %v838_v47 = vld [vmem:[%s1176_s3 + $0x84] ss:$8 sps:$4 sm:$0xff]   ;;  %v62_v8 = vlaneseq }
  0x11   :  { %v799_v48 = vld [vmem:[%s1174_s1 + $0xf4] ss:$8 sps:$4 sm:$0xff]   ;;  %v840_v49 = vld [vmem:[%s1176_s3 + $0x80] ss:$8 sps:$4 sm:$0xff]   ;;  %v801_v50 = vld [vmem:[%s1174_s1 + $0xf0] ss:$8 sps:$4 sm:$0xff]  }
  0x12   :  { %578 = vmatpush1.bf16.msra.mxu1 %v822_v25  ;;  %v841_v51 = vld [vmem:[%s1176_s3 + $0x94] ss:$8 sps:$4 sm:$0xff]   ;;  %v802_v52 = vld [vmem:[%s1175_s0] ss:$8 sps:$4 sm:$0xff]   ;;  %v843_v53 = vld [vmem:[%s1176_s3 + $0x90] ss:$8 sps:$4 sm:$0xff]  }
  0x13   :  { %281 = vmatpush1.bf16.msra.mxu0 %v768_v9  ;;  %579 = vmatprep.subr.bf16.mxu1 %v823_v27  ;;  %v805_v54 = vld [vmem:[%s1175_s0 + $0x14] ss:$8 sps:$4 sm:$0xff]   ;;  %v844_v55 = vld [vmem:[%s1176_s3 + $0xa4] ss:$8 sps:$4 sm:$0xff]   ;;  %v846_v56 = vld [vmem:[%s1176_s3 + $0xa0] ss:$8 sps:$4 sm:$0xff]  }
  0x14   :  { %282 = vmatprep.subr.bf16.mxu0 %v769_v10  ;;  %v847_v57 = vld [vmem:[%s1176_s3 + $0xb4] ss:$8 sps:$4 sm:$0xff]   ;;  %v807_v58 = vld [vmem:[%s1175_s0 + $0x10] ss:$8 sps:$4 sm:$0xff]   ;;  %v808_v60 = vld [vmem:[%s1175_s0 + $0x24] ss:$8 sps:$4 sm:$0xff]  }
  0x15   :  { %v849_v59 = vld [vmem:[%s1176_s3 + $0xb0] ss:$8 sps:$4 sm:$0xff]   ;;  %v850_v61 = vld [vmem:[%s1176_s3 + $0xc4] ss:$8 sps:$4 sm:$0xff]   ;;  %v852_v62 = vld [vmem:[%s1176_s3 + $0xc0] ss:$8 sps:$4 sm:$0xff]  }
  0x16   :  { %580 = vmatpush1.bf16.msra.mxu1 %v825_v29  ;;  %v853_v63 = vld [vmem:[%s1176_s3 + $0xd4] ss:$8 sps:$4 sm:$0xff]   ;;  %v810_v0 = vld [vmem:[%s1175_s0 + $0x20] ss:$8 sps:$4 sm:$0xff]   ;;  %v813_v2 = vld [vmem:[%s1175_s0 + $0x30] ss:$8 sps:$4 sm:$0xff]  }
  0x17   :  { %283 = vmatpush1.bf16.msra.mxu0 %v771_v11  ;;  %581 = vmatprep.subr.bf16.mxu1 %v826_v31  ;;  %v811_v1 = vld [vmem:[%s1175_s0 + $0x34] ss:$8 sps:$4 sm:$0xff]   ;;  %v855_v3 = vld [vmem:[%s1176_s3 + $0xd0] ss:$8 sps:$4 sm:$0xff]   ;;  %v856_v4 = vld [vmem:[%s1176_s3 + $0xe4] ss:$8 sps:$4 sm:$0xff]  }
  0x18   :  { %284 = vmatprep.subr.bf16.mxu0 %v772_v12  ;;  %v858_v5 = vld [vmem:[%s1176_s3 + $0xe0] ss:$8 sps:$4 sm:$0xff]   ;;  %v859_v6 = vld [vmem:[%s1176_s3 + $0xf4] ss:$8 sps:$4 sm:$0xff]   ;;  %v861_v7 = vld [vmem:[%s1176_s3 + $0xf0] ss:$8 sps:$4 sm:$0xff]  }
  0x19   :  { %v1108_v9 = vshrl.u32 %v62_v8, 7  ;;  %v60_v11 = vld [vmem:[%s1177_s2] sm:$0x3] }
  0x1a   :  { %582 = vmatpush1.bf16.msra.mxu1 %v828_v33 }
  0x1b   :  { %285 = vmatpush1.bf16.msra.mxu0 %v774_v14  ;;  %583 = vmatprep.subr.bf16.mxu1 %v829_v35  ;;  %v64_v10 = vsub.s32 0, %v1108_v9  ;;  %v68_v12 = vsub.s32 1, %v1108_v9 }
  0x1c   :  { %286 = vmatprep.subr.bf16.mxu0 %v775_v15 }
  0x1d   :  { %v65_v13 = vrot.slane %v60_v11, %v64_v10  ;;  %v69_v14 = vrot.slane %v60_v11, %v68_v12 }
  0x1e   :  { %584 = vmatpush1.bf16.msra.mxu1 %v831_v37 }
  0x1f   :  { %287 = vmatpush1.bf16.msra.mxu0 %v777_v16  ;;  %585 = vmatprep.subr.bf16.mxu1 %v832_v39 }
  0x20   :  { %288 = vmatprep.subr.bf16.mxu0 %v778_v17 }
  0x22   :  { %586 = vmatpush1.bf16.msra.mxu1 %v834_v41 }
  0x23   :  { %289 = vmatpush1.bf16.msra.mxu0 %v780_v22  ;;  %587 = vmatprep.subr.bf16.mxu1 %v835_v43 }
  0x24   :  { %290 = vmatprep.subr.bf16.mxu0 %v781_v24 }
  0x26   :  { %588 = vmatpush1.bf16.msra.mxu1 %v837_v45 }
  0x27   :  { %291 = vmatpush1.bf16.msra.mxu0 %v783_v26  ;;  %589 = vmatprep.subr.bf16.mxu1 %v838_v47 }
  0x28   :  { %292 = vmatprep.subr.bf16.mxu0 %v784_v28 }
  0x2a   :  { %590 = vmatpush1.bf16.msra.mxu1 %v840_v49 }
  0x2b   :  { %293 = vmatpush1.bf16.msra.mxu0 %v786_v30  ;;  %591 = vmatprep.subr.bf16.mxu1 %v841_v51 }
  0x2c   :  { %294 = vmatprep.subr.bf16.mxu0 %v787_v32 }
  0x2e   :  { %592 = vmatpush1.bf16.msra.mxu1 %v843_v53 }
  0x2f   :  { %295 = vmatpush1.bf16.msra.mxu0 %v789_v34  ;;  %593 = vmatprep.subr.bf16.mxu1 %v844_v55 }
  0x30   :  { %296 = vmatprep.subr.bf16.mxu0 %v790_v36 }
  0x32   :  { %594 = vmatpush1.bf16.msra.mxu1 %v846_v56 }
  0x33   :  { %297 = vmatpush1.bf16.msra.mxu0 %v792_v38  ;;  %595 = vmatprep.subr.bf16.mxu1 %v847_v57 }
  0x34   :  { %298 = vmatprep.subr.bf16.mxu0 %v793_v40 }
  0x36   :  { %596 = vmatpush1.bf16.msra.mxu1 %v849_v59 }
  0x37   :  { %299 = vmatpush1.bf16.msra.mxu0 %v795_v42  ;;  %597 = vmatprep.subr.bf16.mxu1 %v850_v61 }
  0x38   :  { %300 = vmatprep.subr.bf16.mxu0 %v796_v44 }
  0x3a   :  { %598 = vmatpush1.bf16.msra.mxu1 %v852_v62 }
  0x3b   :  { %301 = vmatpush1.bf16.msra.mxu0 %v798_v46  ;;  %599 = vmatprep.subr.bf16.mxu1 %v853_v63 }
  0x3c   :  { %302 = vmatprep.subr.bf16.mxu0 %v799_v48 }
  0x3e   :  { %600 = vmatpush1.bf16.msra.mxu1 %v855_v3 }
  0x3f   :  { %303 = vmatpush1.bf16.msra.mxu0 %v801_v50  ;;  %601 = vmatprep.subr.bf16.mxu1 %v856_v4 }
  0x42   :  { %305 = vmatmul.mubr.bf16.vlgmr.msra.gmra.mrb[0].mxu0 %v802_v52  ;;  %602 = vmatpush1.bf16.msra.mxu1 %v858_v5 }
  0x43   :  { %314 = vmatprep.mubr.bf16.mxu0 %v805_v54  ;;  %603 = vmatprep.subr.bf16.mxu1 %v859_v6 }
  0x46   :  { %604 = vmatpush1.bf16.msra.mxu1 %v861_v7  ;;  %v401_v7 = vld [vmem:[%s1178_s4] sm:$0x3] }
  0x47   :  { %v406_v8 = vrot.slane %v401_v7, %v64_v10  ;;  %v410_v11 = vrot.slane %v401_v7, %v68_v12 }
  0x4a   :  { %315 = vmatmul.mubr.bf16.gmra.mrb[4].mxu0 %v807_v58 }
  0x4b   :  { %324 = vmatprep.mubr.bf16.mxu0 %v808_v60 }
  0x52   :  { %325 = vmatmul.mubr.bf16.gmra.mrb[8].mxu0 %v810_v0 }
  0x53   :  { %334 = vmatprep.mubr.bf16.mxu0 %v811_v1 }
  0x5a   :  { %335 = vmatmul.mubr.bf16.gmra.mrb[12].mxu0 %v813_v2 }
 0x115   :  { %v306_v15 = vpop.f32.mrb[0].mxu0 }
 0x116   :  { %v307_v16 = vadd.f32 %v306_v15, %v65_v13  ;;  %v308_v17 = vpop.f32.mrb[1].mxu0 }
 0x117   :  { %v309_v18 = vadd.f32 %v308_v17, %v69_v14  ;;  %v310_v19 = vpop.f32.mrb[2].mxu0 }
 0x118   :  { %v311_v20 = vadd.f32 %v310_v19, %v65_v13  ;;  %v312_v21 = vpop.f32.mrb[3].mxu0  ;;  %v345_v23 = vmax.f32 %v307_v16, 0.0 }
 0x119   :  { %v313_v22 = vadd.f32 %v312_v21, %v69_v14  ;;  %v346_v25 = vmax.f32 %v309_v18, 0.0 }
 0x11a   :  { %v347_v24 = vmax.f32 %v311_v20, 0.0 }
 0x11b   :  { %v348_v26 = vmax.f32 %v313_v22, 0.0 }
 0x11c   :  { %v361_v27 = vpack.c.bf16 %v347_v24, %v345_v23 }
 0x11d   :  { %v316_v28 = vpop.f32.mrb[4].mxu0  ;;  %v362_v29 = vpack.c.bf16 %v348_v26, %v346_v25 }
 0x11e   :  { %v317_v30 = vadd.f32 %v316_v28, %v65_v13  ;;  %v318_v31 = vpop.f32.mrb[5].mxu0 }
 0x11f   :  { %v319_v32 = vadd.f32 %v318_v31, %v69_v14  ;;  %v320_v33 = vpop.f32.mrb[6].mxu0  ;;  %605 = vmatprep.mubr.bf16.mxu1 %v362_v29 }
 0x120   :  { %v321_v34 = vadd.f32 %v320_v33, %v65_v13  ;;  %v322_v35 = vpop.f32.mrb[7].mxu0  ;;  %606 = vmatmul.mubr.bf16.vlgmr.msra.gmra.mrb[0].mxu1 %v361_v27  ;;  %v349_v37 = vmax.f32 %v317_v30, 0.0 }
 0x121   :  { %v323_v36 = vadd.f32 %v322_v35, %v69_v14  ;;  %v350_v39 = vmax.f32 %v319_v32, 0.0 }
 0x122   :  { %v351_v38 = vmax.f32 %v321_v34, 0.0 }
 0x123   :  { %v352_v40 = vmax.f32 %v323_v36, 0.0 }
 0x124   :  { %v363_v41 = vpack.c.bf16 %v351_v38, %v349_v37 }
 0x125   :  { %v364_v42 = vpack.c.bf16 %v352_v40, %v350_v39  ;;  %v326_v43 = vpop.f32.mrb[8].mxu0 }
 0x126   :  { %v327_v44 = vadd.f32 %v326_v43, %v65_v13  ;;  %v328_v45 = vpop.f32.mrb[9].mxu0 }
 0x127   :  { %v329_v46 = vadd.f32 %v328_v45, %v69_v14  ;;  %v330_v47 = vpop.f32.mrb[10].mxu0  ;;  %615 = vmatprep.mubr.bf16.mxu1 %v364_v42 }
 0x128   :  { %v331_v48 = vadd.f32 %v330_v47, %v65_v13  ;;  %v332_v49 = vpop.f32.mrb[11].mxu0  ;;  %616 = vmatmul.mubr.bf16.gmra.mrb[4].mxu1 %v363_v41  ;;  %v353_v51 = vmax.f32 %v327_v44, 0.0 }
 0x129   :  { %v333_v50 = vadd.f32 %v332_v49, %v69_v14  ;;  %v354_v53 = vmax.f32 %v329_v46, 0.0 }
 0x12a   :  { %v355_v52 = vmax.f32 %v331_v48, 0.0 }
 0x12b   :  { %v356_v54 = vmax.f32 %v333_v50, 0.0 }
 0x12c   :  { %v365_v55 = vpack.c.bf16 %v355_v52, %v353_v51 }
 0x12d   :  { %v366_v56 = vpack.c.bf16 %v356_v54, %v354_v53  ;;  %v336_v57 = vpop.f32.mrb[12].mxu0 }
 0x12e   :  { %v337_v58 = vadd.f32 %v336_v57, %v65_v13  ;;  %v338_v59 = vpop.f32.mrb[13].mxu0 }
 0x12f   :  { %v339_v60 = vadd.f32 %v338_v59, %v69_v14  ;;  %v340_v61 = vpop.f32.mrb[14].mxu0  ;;  %625 = vmatprep.mubr.bf16.mxu1 %v366_v56 }
 0x130   :  { %v341_v62 = vadd.f32 %v340_v61, %v65_v13  ;;  %v342_v63 = vpop.f32.mrb[15].mxu0  ;;  %626 = vmatmul.mubr.bf16.gmra.mrb[8].mxu1 %v365_v55  ;;  %v357_v1 = vmax.f32 %v337_v58, 0.0 }
 0x131   :  { %v343_v0 = vadd.f32 %v342_v63, %v69_v14  ;;  %v358_v3 = vmax.f32 %v339_v60, 0.0 }
 0x132   :  { %v359_v2 = vmax.f32 %v341_v62, 0.0 }
 0x133   :  { %v360_v4 = vmax.f32 %v343_v0, 0.0 }
 0x134   :  { %v367_v5 = vpack.c.bf16 %v359_v2, %v357_v1 }
 0x135   :  { %v368_v6 = vpack.c.bf16 %v360_v4, %v358_v3 }
 0x137   :  { %635 = vmatprep.mubr.bf16.mxu1 %v368_v6 }
 0x138   :  { %636 = vmatmul.mubr.bf16.gmra.mrb[12].mxu1 %v367_v5 }
 0x1f3   :  { %v607_v13 = vpop.f32.mrb[0].mxu1 }
 0x1f4   :  { %v608_v14 = vadd.f32 %v607_v13, %v406_v8  ;;  %v609_v15 = vpop.f32.mrb[1].mxu1 }
 0x1f5   :  { %v610_v16 = vadd.f32 %v609_v15, %v410_v11  ;;  %v611_v17 = vpop.f32.mrb[2].mxu1 }
 0x1f6   :  { %v646_v18 = vmax.f32 %v608_v14, 0.0  ;;  %v612_v19 = vadd.f32 %v611_v17, %v406_v8  ;;  %v613_v20 = vpop.f32.mrb[3].mxu1 }
 0x1f7   :  { %v647_v21 = vmax.f32 %v610_v16, 0.0  ;;  %v614_v22 = vadd.f32 %v613_v20, %v410_v11 }
 0x1f8   :  { %662 = vst [vmem:[%s1179_s5] sm:$0xff] %v646_v18  ;;  %v648_v23 = vmax.f32 %v612_v19, 0.0 }
 0x1f9   :  { %663 = vst [vmem:[%s1179_s5 + $0x8] sm:$0xff] %v647_v21  ;;  %v649_v9 = vmax.f32 %v614_v22, 0.0 }
 0x1fa   :  { %664 = vst [vmem:[%s1179_s5 + $0x10] sm:$0xff] %v648_v23 }
 0x1fb   :  { %665 = vst [vmem:[%s1179_s5 + $0x18] sm:$0xff] %v649_v9  ;;  %v617_v10 = vpop.f32.mrb[4].mxu1 }
 0x1fc   :  { %v618_v12 = vadd.f32 %v617_v10, %v406_v8  ;;  %v619_v24 = vpop.f32.mrb[5].mxu1 }
 0x1fd   :  { %v620_v25 = vadd.f32 %v619_v24, %v410_v11  ;;  %v621_v26 = vpop.f32.mrb[6].mxu1 }
 0x1fe   :  { %v650_v27 = vmax.f32 %v618_v12, 0.0  ;;  %v622_v28 = vadd.f32 %v621_v26, %v406_v8  ;;  %v623_v29 = vpop.f32.mrb[7].mxu1 }
 0x1ff   :  { %v651_v30 = vmax.f32 %v620_v25, 0.0  ;;  %v624_v31 = vadd.f32 %v623_v29, %v410_v11 }
 0x200   :  { %666 = vst [vmem:[%s1179_s5 + $0x20] sm:$0xff] %v650_v27  ;;  %v652_v32 = vmax.f32 %v622_v28, 0.0 }
 0x201   :  { %667 = vst [vmem:[%s1179_s5 + $0x28] sm:$0xff] %v651_v30  ;;  %v653_v33 = vmax.f32 %v624_v31, 0.0 }
 0x202   :  { %668 = vst [vmem:[%s1179_s5 + $0x30] sm:$0xff] %v652_v32 }
 0x203   :  { %669 = vst [vmem:[%s1179_s5 + $0x38] sm:$0xff] %v653_v33  ;;  %v627_v34 = vpop.f32.mrb[8].mxu1 }
 0x204   :  { %v628_v35 = vadd.f32 %v627_v34, %v406_v8  ;;  %v629_v36 = vpop.f32.mrb[9].mxu1 }
 0x205   :  { %v630_v37 = vadd.f32 %v629_v36, %v410_v11  ;;  %v631_v38 = vpop.f32.mrb[10].mxu1 }
 0x206   :  { %v654_v39 = vmax.f32 %v628_v35, 0.0  ;;  %v632_v40 = vadd.f32 %v631_v38, %v406_v8  ;;  %v633_v41 = vpop.f32.mrb[11].mxu1 }
 0x207   :  { %v655_v42 = vmax.f32 %v630_v37, 0.0  ;;  %v634_v43 = vadd.f32 %v633_v41, %v410_v11 }
 0x208   :  { %670 = vst [vmem:[%s1179_s5 + $0x40] sm:$0xff] %v654_v39  ;;  %v656_v44 = vmax.f32 %v632_v40, 0.0 }
 0x209   :  { %671 = vst [vmem:[%s1179_s5 + $0x48] sm:$0xff] %v655_v42  ;;  %v657_v45 = vmax.f32 %v634_v43, 0.0 }
 0x20a   :  { %672 = vst [vmem:[%s1179_s5 + $0x50] sm:$0xff] %v656_v44 }
 0x20b   :  { %673 = vst [vmem:[%s1179_s5 + $0x58] sm:$0xff] %v657_v45  ;;  %v637_v46 = vpop.f32.mrb[12].mxu1 }
 0x20c   :  { %v638_v47 = vadd.f32 %v637_v46, %v406_v8  ;;  %v639_v48 = vpop.f32.mrb[13].mxu1 }
 0x20d   :  { %v640_v49 = vadd.f32 %v639_v48, %v410_v11  ;;  %v641_v50 = vpop.f32.mrb[14].mxu1 }
 0x20e   :  { %v658_v51 = vmax.f32 %v638_v47, 0.0  ;;  %v642_v52 = vadd.f32 %v641_v50, %v406_v8  ;;  %v643_v53 = vpop.f32.mrb[15].mxu1 }
 0x20f   :  { %v659_v54 = vmax.f32 %v640_v49, 0.0  ;;  %v644_v55 = vadd.f32 %v643_v53, %v410_v11 }
 0x210   :  { %674 = vst [vmem:[%s1179_s5 + $0x60] sm:$0xff] %v658_v51  ;;  %v660_v56 = vmax.f32 %v642_v52, 0.0 }
 0x211   :  { %675 = vst [vmem:[%s1179_s5 + $0x68] sm:$0xff] %v659_v54  ;;  %v661_v57 = vmax.f32 %v644_v55, 0.0 }
 0x212   :  { %676 = vst [vmem:[%s1179_s5 + $0x70] sm:$0xff] %v660_v56 }
 0x213   :  { %677 = vst [vmem:[%s1179_s5 + $0x78] sm:$0xff] %v661_v57 }

</bundles_post_ra>
